<compile_context>
chip_gen: v6e
topology: v6e:2x2x1
jax: 0.10.0
libtpu: 0.0.40
codegen_flags: <defaults>
</compile_context>

<pallas_src>
import functools

import jax
import jax.numpy as jnp
from jax.experimental import pallas as pl
from jax.experimental.pallas import tpu as pltpu


def _bgat_kernel(x_ref, w_ref, ap_ref, bias_ref, beta_ref, out_ref, *,
                 alpha, matmul_dtype):
    """One grid step = TB graphs, folded into a flat (TB*N, .) node axis.

    x_ref:    (TB*N, C)      VMEM
    w_ref:    (C, F)         VMEM (resident)
    ap_ref:   (F, 2)         VMEM (resident)  columns = [a1, a2]
    bias_ref: (TB*N, TB*N)   VMEM (resident)  0 within graph, -1e30 across
    beta_ref: (1, 1)         SMEM scalar
    out_ref:  (TB*N, F)      VMEM
    """
    x = x_ref[...]                                              # (TBN, C) f32
    w = w_ref[...]                                              # (C, F)   f32

    # h = x @ W  — one big MXU matmul (bf16 operands, f32 accumulate).
    h = jnp.dot(x.astype(matmul_dtype), w.astype(matmul_dtype),
                preferred_element_type=jnp.float32)             # (TBN, F) f32

    # Fused attention-logit projections: col0 = h@a1, col1 = h@a2.
    s = jnp.dot(h, ap_ref[...], preferred_element_type=jnp.float32)  # (TBN, 2)

    # e[i, j] = (h[i]@a1) + (h[j]@a2), then LeakyReLU, then block-diag mask.
    e = s[:, 0:1] + s[:, 1:2].T                                 # (TBN, TBN)
    e = jnp.where(e > 0, e, alpha * e)                          # LeakyReLU
    e = e + bias_ref[...]                                       # mask other graphs

    # Numerically stable softmax over neighbors (lane axis).
    e_max = jnp.max(e, axis=-1, keepdims=True)
    p = jnp.exp(e - e_max)
    denom = jnp.sum(p, axis=-1, keepdims=True)
    attn = p * pl.reciprocal(denom, approx=True)
    # TODO(synk): dropout on `attn` skipped (eval mode / training=False).

    # h' = attn @ h — block-diagonal attn == per-graph bmm, one MXU matmul.
    h_prime = jnp.dot(attn.astype(matmul_dtype), h.astype(matmul_dtype),
                      preferred_element_type=jnp.float32)       # (TBN, F)

    beta = beta_ref[0, 0]
    z = h_prime + beta * h
    # ELU (alpha=1).  (jnp.expm1 would be marginally better near 0.)
    out = jnp.where(z > 0, z, jnp.exp(z) - 1.0)
    out_ref[...] = out.astype(out_ref.dtype)


def _pick_batch_tile(B, N, max_rows=512):
    """Largest divisor of B with TB*N <= max_rows, preferring >=2 grid steps
    (keeps both v7x TensorCores busy)."""
    best_any, best_multi = 1, None
    for tb in range(1, B + 1):
        if B % tb != 0 or tb * N > max_rows:
            continue
        best_any = tb
        if B // tb >= 2:
            best_multi = tb
    return best_multi if best_multi is not None else best_any


def bgat_forward(x, W, a, beta, *, alpha, matmul_dtype=jnp.bfloat16,
                 batch_tile=None):
    """Pallas BGATLayer forward. x: (B, N, C) f32 -> (B, N, F_out) f32."""
    B, N, C = x.shape
    F_out = W.shape[1]
    assert a.shape == (2 * F_out, 1)

    tb = batch_tile if batch_tile is not None else _pick_batch_tile(B, N)
    assert B % tb == 0, "batch_tile must divide B"
    tbn = tb * N
    grid = (B // tb,)

    # Host-side prep (all cheap, done once):
    x_flat = x.reshape(B * N, C)                               # free reshape
    a_pair = jnp.concatenate([a[:F_out], a[F_out:]], axis=1)   # (F, 2)
    beta_arr = jnp.asarray(beta, jnp.float32).reshape(1, 1)
    graph_id = jnp.arange(tbn, dtype=jnp.int32) // N
    bias = jnp.where(graph_id[:, None] == graph_id[None, :],
                     0.0, -1e30).astype(jnp.float32)           # (TBN, TBN)

    kernel = functools.partial(_bgat_kernel, alpha=float(alpha),
                               matmul_dtype=matmul_dtype)

    out_flat = pl.pallas_call(
        kernel,
        out_shape=jax.ShapeDtypeStruct((B * N, F_out), x.dtype),
        grid=grid,
        in_specs=[
            pl.BlockSpec((tbn, C), lambda i: (i, 0)),
            pl.BlockSpec((C, F_out), lambda i: (0, 0)),
            pl.BlockSpec((F_out, 2), lambda i: (0, 0)),
            pl.BlockSpec((tbn, tbn), lambda i: (0, 0)),
            pl.BlockSpec((1, 1), lambda i: (0, 0), memory_space=pltpu.SMEM),
        ],
        out_specs=pl.BlockSpec((tbn, F_out), lambda i: (i, 0)),
        compiler_params=pltpu.CompilerParams(
            dimension_semantics=("parallel",)),
    )(x_flat, W, a_pair, bias, beta_arr)

    return out_flat.reshape(B, N, F_out)


def bgat_reference(x, W, a, beta, *, alpha):
    """Pure-JAX reference mirroring the PyTorch forward (eval mode)."""
    B, N, C = x.shape
    F_out = W.shape[1]
    h = jnp.einsum("bnc,cf->bnf", x, W)
    e1 = jnp.einsum("bnf,f->bn", h, a[:F_out, 0])
    e2 = jnp.einsum("bnf,f->bn", h, a[F_out:, 0])
    e = e1[:, :, None] + e2[:, None, :]
    e = jnp.where(e > 0, e, alpha * e)
    attn = jax.nn.softmax(e, axis=2)
    h_prime = jnp.einsum("bij,bjf->bif", attn, h)
    z = h_prime + beta * h
    return jnp.where(z > 0, z, jnp.exp(z) - 1.0)


def xavier_uniform(key, shape, gain):
    fan_in, fan_out = shape[0], shape[1]
    bound = gain * jnp.sqrt(6.0 / (fan_in + fan_out))
    return jax.random.uniform(key, shape, jnp.float32, -bound, bound)


if __name__ == "__main__":
    # Small but MXU-friendly shapes: 32 graphs of 8 nodes, in=out features=32.
    # batch_tile picks TB=16 -> per-step node block (128, 32), grid=(2,).
    B, N, C = 32, 8, 32
    F_out = C                      # required by the module's view() trick
    alpha = 0.2                    # LeakyReLU negative slope
    gain = 1.414

    key = jax.random.PRNGKey(0)
    kx, kw, ka = jax.random.split(key, 3)

    x = jax.random.normal(kx, (B, N, C), jnp.float32)
    W = xavier_uniform(kw, (C, F_out), gain)
    a = xavier_uniform(ka, (2 * F_out, 1), gain)
    beta = jnp.float32(1.0)

    ref = bgat_reference(x, W, a, beta, alpha=alpha)

    # f32 MXU path: tight check (slack only for the approx softmax reciprocal).
    out_f32 = bgat_forward(x, W, a, beta, alpha=alpha,
                           matmul_dtype=jnp.float32)
    out_f32 = jax.block_until_ready(out_f32)
    assert out_f32.shape == (B, N, F_out)
    assert jnp.allclose(out_f32, ref, atol=1e-2, rtol=1e-2), "f32 mismatch"

    # Default bf16-MXU path (perf-preferred on v5e/v6e/v7x): looser tolerance.
    out = bgat_forward(x, W, a, beta, alpha=alpha)
    out = jax.block_until_ready(out)
    assert out.shape == (B, N, F_out)
    assert jnp.allclose(out, ref, atol=1e-1, rtol=1e-1), "bf16 mismatch"

    print("KERNEL_OK")
</pallas_src>

<mosaic_0001>
module attributes {stable_mosaic.version = 11 : i64} {
  func.func @_bgat_kernel(%arg0: i32, %arg1: memref<128x32xf32, #tpu.memory_space<vmem>>, %arg2: memref<32x32xf32, #tpu.memory_space<vmem>>, %arg3: memref<32x2xf32, #tpu.memory_space<vmem>>, %arg4: memref<128x128xf32, #tpu.memory_space<vmem>>, %arg5: memref<1x1xf32, #tpu.memory_space<smem>>, %arg6: memref<128x32xf32, #tpu.memory_space<vmem>>) attributes {dimension_semantics = [#tpu.dimension_semantics<parallel>], iteration_bounds = array<i64: 2>, scalar_prefetch = 0 : i64, scratch_operands = 0 : i64, tpu.core_type = #tpu.core_type<tc>, window_params = [{transform_indices = @transform_0, window_bounds = array<i64: 128, 32>}, {pipeline_mode = #tpu.pipeline_mode<synchronous>, transform_indices = @transform_1, window_bounds = array<i64: 32, 32>}, {pipeline_mode = #tpu.pipeline_mode<synchronous>, transform_indices = @transform_2, window_bounds = array<i64: 32, 2>}, {pipeline_mode = #tpu.pipeline_mode<synchronous>, transform_indices = @transform_3, window_bounds = array<i64: 128, 128>}, {transform_indices = @transform_4, window_bounds = array<i64: 1, 1>}, {transform_indices = @transform_5, window_bounds = array<i64: 128, 32>}]} {
    %c0 = arith.constant 0 : index
    %c0_0 = arith.constant 0 : index
    %0 = vector.load %arg1[%c0, %c0_0] : memref<128x32xf32, #tpu.memory_space<vmem>>, vector<128x32xf32>
    %c0_1 = arith.constant 0 : index
    %c0_2 = arith.constant 0 : index
    %1 = vector.load %arg2[%c0_1, %c0_2] : memref<32x32xf32, #tpu.memory_space<vmem>>, vector<32x32xf32>
    %cst = arith.constant dense<0.000000e+00> : vector<128x32xf32>
    %2 = tpu.matmul %0, %1, %cst {dimension_numbers = #tpu.dot_dimension_numbers<[1], [0], [0], [1], [0, 0, 1, 1], [], []>} : vector<128x32xf32>, vector<32x32xf32>, vector<128x32xf32> -> vector<128x32xf32>
    %c0_3 = arith.constant 0 : index
    %c0_4 = arith.constant 0 : index
    %3 = vector.load %arg3[%c0_3, %c0_4] : memref<32x2xf32, #tpu.memory_space<vmem>>, vector<32x2xf32>
    %cst_5 = arith.constant dense<0.000000e+00> : vector<128x2xf32>
    %4 = tpu.matmul %2, %3, %cst_5 {dimension_numbers = #tpu.dot_dimension_numbers<[1], [0], [0], [1], [0, 0, 1, 1], [], []>} : vector<128x32xf32>, vector<32x2xf32>, vector<128x2xf32> -> vector<128x2xf32>
    %5 = vector.extract_strided_slice %4 {offsets = [0, 0], sizes = [128, 1], strides = [1, 1]} : vector<128x2xf32> to vector<128x1xf32>
    %6 = vector.extract_strided_slice %4 {offsets = [0, 1], sizes = [128, 1], strides = [1, 1]} : vector<128x2xf32> to vector<128x1xf32>
    %7 = tpu.transpose %6, [1, 0] : vector<128x1xf32> -> vector<1x128xf32>
    %8 = vector.broadcast %5 : vector<128x1xf32> to vector<128x128xf32>
    %9 = vector.broadcast %7 : vector<1x128xf32> to vector<128x128xf32>
    %10 = arith.addf %8, %9 : vector<128x128xf32>
    %cst_6 = arith.constant 0.000000e+00 : f32
    %11 = vector.broadcast %cst_6 : f32 to vector<128x128xf32>
    %12 = arith.cmpf ogt, %10, %11 : vector<128x128xf32>
    %cst_7 = arith.constant 2.000000e-01 : f32
    %13 = vector.broadcast %cst_7 : f32 to vector<128x128xf32>
    %14 = arith.mulf %13, %10 : vector<128x128xf32>
    %15 = arith.select %12, %10, %14 : vector<128x128xi1>, vector<128x128xf32>
    %c0_8 = arith.constant 0 : index
    %c0_9 = arith.constant 0 : index
    %16 = vector.load %arg4[%c0_8, %c0_9] : memref<128x128xf32, #tpu.memory_space<vmem>>, vector<128x128xf32>
    %17 = arith.addf %15, %16 : vector<128x128xf32>
    %cst_10 = arith.constant dense<0xFF800000> : vector<128xf32>
    %18 = vector.multi_reduction <maximumf>, %17, %cst_10 [1] : vector<128x128xf32> to vector<128xf32>
    %19 = vector.shape_cast %18 : vector<128xf32> to vector<128x1xf32>
    %20 = vector.broadcast %19 : vector<128x1xf32> to vector<128x128xf32>
    %21 = arith.subf %17, %20 : vector<128x128xf32>
    %22 = math.exp %21 : vector<128x128xf32>
    %cst_11 = arith.constant dense<0.000000e+00> : vector<128xf32>
    %23 = vector.multi_reduction <add>, %22, %cst_11 [1] : vector<128x128xf32> to vector<128xf32>
    %24 = vector.shape_cast %23 : vector<128xf32> to vector<128x1xf32>
    %25 = tpu.reciprocal %24 {approx = true} : vector<128x1xf32> -> vector<128x1xf32>
    %26 = vector.broadcast %25 : vector<128x1xf32> to vector<128x128xf32>
    %27 = arith.mulf %22, %26 : vector<128x128xf32>
    %cst_12 = arith.constant dense<0.000000e+00> : vector<128x32xf32>
    %28 = tpu.matmul %27, %2, %cst_12 {dimension_numbers = #tpu.dot_dimension_numbers<[1], [0], [0], [1], [0, 0, 1, 1], [], []>} : vector<128x128xf32>, vector<128x32xf32>, vector<128x32xf32> -> vector<128x32xf32>
    %c0_13 = arith.constant 0 : index
    %c0_14 = arith.constant 0 : index
    %29 = memref.load %arg5[%c0_13, %c0_14] : memref<1x1xf32, #tpu.memory_space<smem>>
    %30 = vector.broadcast %29 : f32 to vector<128x32xf32>
    %31 = arith.mulf %30, %2 : vector<128x32xf32>
    %32 = arith.addf %28, %31 : vector<128x32xf32>
    %cst_15 = arith.constant 0.000000e+00 : f32
    %33 = vector.broadcast %cst_15 : f32 to vector<128x32xf32>
    %34 = arith.cmpf ogt, %32, %33 : vector<128x32xf32>
    %35 = math.exp %32 : vector<128x32xf32>
    %cst_16 = arith.constant 1.000000e+00 : f32
    %36 = vector.broadcast %cst_16 : f32 to vector<128x32xf32>
    %37 = arith.subf %35, %36 : vector<128x32xf32>
    %38 = arith.select %34, %32, %37 : vector<128x32xi1>, vector<128x32xf32>
    %c0_17 = arith.constant 0 : index
    %c0_18 = arith.constant 0 : index
    %39 = vector.load %arg6[%c0_17, %c0_18] : memref<128x32xf32, #tpu.memory_space<vmem>>, vector<128x32xf32>
    tpu.vector_store %arg6[%c0_17, %c0_18], %38 {strides = array<i32>} : memref<128x32xf32, #tpu.memory_space<vmem>>, vector<128x32xf32>,
    return
  }
  func.func @transform_0(%arg0: i32) -> (i32, i32) {
    %c0_i32 = arith.constant 0 : i32
    %c0_i32_0 = arith.constant 0 : i32
    return %arg0, %c0_i32 : i32, i32
  }
  func.func @transform_1(%arg0: i32) -> (i32, i32) {
    %c0_i32 = arith.constant 0 : i32
    %c0_i32_0 = arith.constant 0 : i32
    %c0_i32_1 = arith.constant 0 : i32
    return %c0_i32, %c0_i32_0 : i32, i32
  }
  func.func @transform_2(%arg0: i32) -> (i32, i32) {
    %c0_i32 = arith.constant 0 : i32
    %c0_i32_0 = arith.constant 0 : i32
    %c0_i32_1 = arith.constant 0 : i32
    return %c0_i32, %c0_i32_0 : i32, i32
  }
  func.func @transform_3(%arg0: i32) -> (i32, i32) {
    %c0_i32 = arith.constant 0 : i32
    %c0_i32_0 = arith.constant 0 : i32
    %c0_i32_1 = arith.constant 0 : i32
    return %c0_i32, %c0_i32_0 : i32, i32
  }
  func.func @transform_4(%arg0: i32) -> (i32, i32) {
    %c0_i32 = arith.constant 0 : i32
    %c0_i32_0 = arith.constant 0 : i32
    %c0_i32_1 = arith.constant 0 : i32
    return %c0_i32, %c0_i32_0 : i32, i32
  }
  func.func @transform_5(%arg0: i32) -> (i32, i32) {
    %c0_i32 = arith.constant 0 : i32
    %c0_i32_0 = arith.constant 0 : i32
    return %arg0, %c0_i32 : i32, i32
  }
}

</mosaic_0001>

<bundles_post_ra>
// kernel: tpu_custom_call.1
= control target key start
LH: loop header
LB: loop body
LE: loop exit
PB: predicated region body
PF: predicated region fallthrough
CT: control target
= control target key end

     0   :  { %s1793_s20 = smov 0   ;;  %s2302_s0 = inlined_call_operand.vmem [shape: f32[256,32], index: 0, kind: input, shape index: {}]   ;;  %s2303_s1 = inlined_call_operand.vmem [shape: f32[32,32], index: 1, kind: input, shape index: {}]   ;;  %s2304_s2 = inlined_call_operand.vmem [shape: f32[32,2], index: 2, kind: input, shape index: {}]   ;;  %s2305_s3 = inlined_call_operand.vmem [shape: f32[128,128], index: 3, kind: input, shape index: {}]   ;;  %s2306_s4 = inlined_call_operand.<no memory space> [shape: f32[1,1], index: 4, kind: input, shape index: {}]   ;;  %s2307_s5 = inlined_call_operand.vmem [shape: f32[256,32], index: 5, kind: output, shape index: {}]  }
   0x1   :  { %10 = sst [smem:[#allocation2]] %s2306_s4 }
   0x2 LB: > { %s1359_s21 = sadd.s32 4294967295, %s1756_s20   ;;  %p1363_p0 = scmp.ge.s32.totalorder %s1756_s20, 1  ;;  %s1756_s20 = sphi %s1793_s20, %s16_s20  }
   0x3   : > { %p189_p1 = scmp.lt.s32.totalorder %s1756_s20, 3 }
   0x5   : > { %p190_p2 = pnand %p1363_p0, %p189_p1 }
   0x6   : > { %s1364_s25 = sshll.u32 (!%p190_p2), %s1359_s21, 4  ;;  %s1759_s17 = smov (!%p190_p2), 127  }
   0x7   : > { %193 = sbr.rel (%p190_p2) target bundleno = 1259 (0x4eb), region = 40  ;;  %p218_p3 = scmp.lt.s32.totalorder (!%p190_p2), %s1364_s25, 31 }
   0x8   : > { %s1044_s28 = sld [smem:[#allocation2]] (!%p190_p2) }
   0xc   : > { %v248_v0 = vld [vmem:[%s2303_s1 + $0x18] sm:$0xff]  ;;  %v247_v1 = vld [vmem:[%s2303_s1 + $0x10] sm:$0xff]  ;;  %v246_v4 = vld [vmem:[%s2303_s1 + $0x8] sm:$0xff]  ;;  %s2309_s25 = smov (!%p218_p3, %s1364_s25), 31  ;;  %vm249_vm0 = vcmask 261120   ;;  %v1758_v24 = vmov 0  }
   0xd   : > { %1490 = vmatprep.subr.mxu0 %v248_v0  ;;  %v446_v2 = vld [vmem:[%s2304_s2 + $0x18] sm:$0xff]  ;;  %v445_v3 = vld [vmem:[%s2304_s2 + $0x10] sm:$0xff]  ;;  %v245_v5 = vld [vmem:[%s2303_s1] sm:$0xff]  ;;  %s1365_s9 = sshll.u32 %s2309_s25, 3  ;;  %1652 = vset.pattern.permute.xlu1 %v1758_v24 }
   0xe   : > { %1491 = vmatpush3.msra.mxu0 %v248_v0  ;;  %1522 = vmatprep.subr.mxu1 %v446_v2  ;;  %s1827_s12 = scalar_lea.vmem %s2302_s0, %s1365_s9  ;;  %v444_v22 = vld [vmem:[%s2304_s2 + $0x8] sm:$0xff]  ;;  %v443_v23 = vld [vmem:[%s2304_s2] sm:$0xff]  ;;  %s2245_s6 = scalar_lea.vmem %s2307_s5, %s1365_s9 }
   0xf   : > { %1492 = vmatprep.subr.mxu0 %v247_v1  ;;  %1523 = vmatpush3.msra.mxu1 %v446_v2  ;;  %v229_v6 = vld [vmem:[%s1827_s12] sm:$0xff]  ;;  %v230_v7 = vld [vmem:[%s1827_s12 + $0x8] sm:$0xff]  ;;  %v231_v8 = vld [vmem:[%s1827_s12 + $0x10] sm:$0xff] }
  0x10   : > { %1493 = vmatpush3.msra.mxu0 %v247_v1  ;;  %1524 = vmatprep.subr.mxu1 %v445_v3  ;;  %v232_v9 = vld [vmem:[%s1827_s12 + $0x18] sm:$0xff]  ;;  %v233_v10 = vld [vmem:[%s1827_s12 + $0x20] sm:$0xff]  ;;  %v234_v11 = vld [vmem:[%s1827_s12 + $0x28] sm:$0xff] }
  0x11   : > { %1494 = vmatprep.subr.mxu0 %v246_v4  ;;  %1525 = vmatpush3.msra.mxu1 %v445_v3  ;;  %v235_v12 = vld [vmem:[%s1827_s12 + $0x30] sm:$0xff]  ;;  %v236_v13 = vld [vmem:[%s1827_s12 + $0x38] sm:$0xff]  ;;  %v237_v14 = vld [vmem:[%s1827_s12 + $0x40] sm:$0xff] }
  0x12   : > { %1495 = vmatpush3.msra.mxu0 %v246_v4  ;;  %1498 = vmatprep.mubr.msk.f32.mxu0 %vm249_vm0, %v229_v6  ;;  %v238_v15 = vld [vmem:[%s1827_s12 + $0x48] sm:$0xff]  ;;  %v239_v16 = vld [vmem:[%s1827_s12 + $0x50] sm:$0xff]  ;;  %v240_v17 = vld [vmem:[%s1827_s12 + $0x58] sm:$0xff] }
  0x13   : > { %1496 = vmatprep.subr.mxu0 %v245_v5  ;;  %v241_v18 = vld [vmem:[%s1827_s12 + $0x60] sm:$0xff]  ;;  %v242_v19 = vld [vmem:[%s1827_s12 + $0x68] sm:$0xff]  ;;  %v243_v20 = vld [vmem:[%s1827_s12 + $0x70] sm:$0xff]  ;;  %1526 = vmatprep.subr.mxu1 %v444_v22 }
  0x14   : > { %1497 = vmatpush3.msra.mxu0 %v245_v5  ;;  %v244_v21 = vld [vmem:[%s1827_s12 + $0x78] sm:$0xff]  ;;  %1527 = vmatpush3.msra.mxu1 %v444_v22 }
  0x15   : > { %1499 = vmatmul.mubr.msk.f32.vlgmr.msra.gmra.mxu0 %vm249_vm0, %v230_v7  ;;  %1528 = vmatprep.subr.mxu1 %v443_v23 }
  0x16   : > { %1501 = vmatprep.mubr.msk.f32.mxu0 %vm249_vm0, %v231_v8  ;;  %1529 = vmatpush3.msra.mxu1 %v443_v23 }
  0x17   : > { %1653 = vset.pattern.permute.xlu0 %v1758_v24 }
  0x19   : > { %1502 = vmatmul.mubr.msk.f32.gmra.mxu0 %vm249_vm0, %v232_v9 }
  0x1a   : > { %1504 = vmatprep.mubr.msk.f32.mxu0 %vm249_vm0, %v233_v10 }
  0x1d   : > { %1505 = vmatmul.mubr.msk.f32.gmra.mxu0 %vm249_vm0, %v234_v11 }
  0x1e   : > { %1507 = vmatprep.mubr.msk.f32.mxu0 %vm249_vm0, %v235_v12 }
  0x21   : > { %1508 = vmatmul.mubr.msk.f32.gmra.mxu0 %vm249_vm0, %v236_v13 }
  0x22   : > { %1510 = vmatprep.mubr.msk.f32.mxu0 %vm249_vm0, %v237_v14 }
  0x25   : > { %1511 = vmatmul.mubr.msk.f32.gmra.mxu0 %vm249_vm0, %v238_v15 }
  0x26   : > { %1513 = vmatprep.mubr.msk.f32.mxu0 %vm249_vm0, %v239_v16 }
  0x29   : > { %1514 = vmatmul.mubr.msk.f32.gmra.mxu0 %vm249_vm0, %v240_v17 }
  0x2a   : > { %1516 = vmatprep.mubr.msk.f32.mxu0 %vm249_vm0, %v241_v18 }
  0x2d   : > { %1517 = vmatmul.mubr.msk.f32.gmra.mxu0 %vm249_vm0, %v242_v19 }
  0x2e   : > { %1519 = vmatprep.mubr.msk.f32.mxu0 %vm249_vm0, %v243_v20  ;;  %v800_v20 = vlaneseq }
  0x30   : > { %v801_v22 = vshrl.u32 %v800_v20, 7 }
  0x31   : > { %1520 = vmatmul.mubr.msk.f32.gmra.mxu0 %vm249_vm0, %v244_v21 }
  0x32   : > { %v802_v24 = vsub.s32 0, %v801_v22  ;;  %v879_v22 = vld [vmem:[%s2305_s3 + $0x58] sm:$0xff] }
  0xd5   : > { %v1867_v25 = vpop.f32.mrf.mxu0 }
  0xd7   : > { %v1869_v26 = vpop.f32.mrf.mxu0 }
  0xd8   : > { %1530 = vmatprep.mubr.msk.f32.mxu1 %vm249_vm0, %v1869_v26 }
  0xd9   : > { %v1873_v27 = vpop.f32.mrf.mxu0  ;;  %1531 = vmatmul.mubr.msk.f32.vlgmr.msra.gmra.mxu1 %vm249_vm0, %v1867_v25 }
  0xdb   : > { %v1877_v28 = vpop.f32.mrf.mxu0 }
  0xdc   : > { %1533 = vmatprep.mubr.msk.f32.mxu1 %vm249_vm0, %v1877_v28 }
  0xdd   : > { %v1881_v29 = vpop.f32.mrf.mxu0  ;;  %1534 = vmatmul.mubr.msk.f32.gmra.mxu1 %vm249_vm0, %v1873_v27 }
  0xdf   : > { %v1885_v30 = vpop.f32.mrf.mxu0 }
  0xe0   : > { %1536 = vmatprep.mubr.msk.f32.mxu1 %vm249_vm0, %v1885_v30 }
  0xe1   : > { %v1889_v31 = vpop.f32.mrf.mxu0  ;;  %1537 = vmatmul.mubr.msk.f32.gmra.mxu1 %vm249_vm0, %v1881_v29 }
  0xe3   : > { %v1893_v32 = vpop.f32.mrf.mxu0 }
  0xe4   : > { %1539 = vmatprep.mubr.msk.f32.mxu1 %vm249_vm0, %v1893_v32 }
  0xe5   : > { %v1897_v33 = vpop.f32.mrf.mxu0  ;;  %1540 = vmatmul.mubr.msk.f32.gmra.mxu1 %vm249_vm0, %v1889_v31 }
  0xe7   : > { %v1901_v34 = vpop.f32.mrf.mxu0 }
  0xe8   : > { %1542 = vmatprep.mubr.msk.f32.mxu1 %vm249_vm0, %v1901_v34 }
  0xe9   : > { %v1905_v35 = vpop.f32.mrf.mxu0  ;;  %1543 = vmatmul.mubr.msk.f32.gmra.mxu1 %vm249_vm0, %v1897_v33 }
  0xeb   : > { %v1909_v36 = vpop.f32.mrf.mxu0 }
  0xec   : > { %1545 = vmatprep.mubr.msk.f32.mxu1 %vm249_vm0, %v1909_v36 }
  0xed   : > { %v1913_v37 = vpop.f32.mrf.mxu0  ;;  %1546 = vmatmul.mubr.msk.f32.gmra.mxu1 %vm249_vm0, %v1905_v35 }
  0xef   : > { %v1917_v38 = vpop.f32.mrf.mxu0 }
  0xf0   : > { %1548 = vmatprep.mubr.msk.f32.mxu1 %vm249_vm0, %v1917_v38 }
  0xf1   : > { %v1921_v39 = vpop.f32.mrf.mxu0  ;;  %1549 = vmatmul.mubr.msk.f32.gmra.mxu1 %vm249_vm0, %v1913_v37 }
  0xf2   : > { %1554 = vmatprep.subr.mxu0 %v1921_v39  ;;  %1610 = vmatprep.subr.mxu1 %v1921_v39 }
  0xf3   : > { %v1927_v40 = vpop.f32.mrf.mxu0  ;;  %1555 = vmatpush3.msra.mxu0 %v1921_v39  ;;  %1626 = vmatpush3.msra.mxu1 %v1921_v39 }
  0xf4   : > { %1556 = vmatprep.subr.mxu0 %v1927_v40  ;;  %1611 = vmatprep.subr.mxu1 %v1927_v40 }
  0xf5   : > { %1557 = vmatpush3.msra.mxu0 %v1927_v40  ;;  %1627 = vmatpush3.msra.mxu1 %v1927_v40 }
  0xf6   : > { %1558 = vmatprep.subr.mxu0 %v1913_v37  ;;  %1612 = vmatprep.subr.mxu1 %v1913_v37 }
  0xf7   : > { %1559 = vmatpush3.msra.mxu0 %v1913_v37  ;;  %1628 = vmatpush3.msra.mxu1 %v1913_v37 }
  0xf8   : > { %1560 = vmatprep.subr.mxu0 %v1917_v38  ;;  %1613 = vmatprep.subr.mxu1 %v1917_v38 }
  0xf9   : > { %1561 = vmatpush3.msra.mxu0 %v1917_v38  ;;  %1629 = vmatpush3.msra.mxu1 %v1917_v38 }
  0xfa   : > { %1562 = vmatprep.subr.mxu0 %v1905_v35  ;;  %1614 = vmatprep.subr.mxu1 %v1905_v35 }
  0xfb   : > { %1563 = vmatpush3.msra.mxu0 %v1905_v35  ;;  %1630 = vmatpush3.msra.mxu1 %v1905_v35 }
  0xfc   : > { %1564 = vmatprep.subr.mxu0 %v1909_v36  ;;  %1615 = vmatprep.subr.mxu1 %v1909_v36 }
  0xfd   : > { %1565 = vmatpush3.msra.mxu0 %v1909_v36  ;;  %1631 = vmatpush3.msra.mxu1 %v1909_v36 }
  0xfe   : > { %1566 = vmatprep.subr.mxu0 %v1897_v33  ;;  %1616 = vmatprep.subr.mxu1 %v1897_v33 }
  0xff   : > { %1567 = vmatpush3.msra.mxu0 %v1897_v33  ;;  %1632 = vmatpush3.msra.mxu1 %v1897_v33 }
 0x100   : > { %1568 = vmatprep.subr.mxu0 %v1901_v34  ;;  %1617 = vmatprep.subr.mxu1 %v1901_v34 }
 0x101   : > { %1569 = vmatpush3.msra.mxu0 %v1901_v34  ;;  %1633 = vmatpush3.msra.mxu1 %v1901_v34 }
 0x102   : > { %1570 = vmatprep.subr.mxu0 %v1889_v31  ;;  %1618 = vmatprep.subr.mxu1 %v1889_v31 }
 0x103   : > { %1571 = vmatpush3.msra.mxu0 %v1889_v31  ;;  %1634 = vmatpush3.msra.mxu1 %v1889_v31 }
 0x104   : > { %1572 = vmatprep.subr.mxu0 %v1893_v32  ;;  %1619 = vmatprep.subr.mxu1 %v1893_v32 }
 0x105   : > { %1573 = vmatpush3.msra.mxu0 %v1893_v32  ;;  %1635 = vmatpush3.msra.mxu1 %v1893_v32 }
 0x106   : > { %1551 = vmatprep.mubr.msk.f32.mxu1 %vm249_vm0, %v1927_v40  ;;  %1574 = vmatprep.subr.mxu0 %v1881_v29 }
 0x107   : > { %1620 = vmatprep.subr.mxu1 %v1881_v29  ;;  %1552 = vmatmul.mubr.msk.f32.gmra.mxu1 %vm249_vm0, %v1921_v39 }
 0x108   : > { %1575 = vmatpush3.msra.mxu0 %v1881_v29  ;;  %1636 = vmatpush3.msra.mxu1 %v1881_v29 }
 0x109   : > { %1576 = vmatprep.subr.mxu0 %v1885_v30  ;;  %1621 = vmatprep.subr.mxu1 %v1885_v30 }
 0x10a   : > { %1577 = vmatpush3.msra.mxu0 %v1885_v30  ;;  %1637 = vmatpush3.msra.mxu1 %v1885_v30 }
 0x10b   : > { %1578 = vmatprep.subr.mxu0 %v1873_v27  ;;  %1622 = vmatprep.subr.mxu1 %v1873_v27 }
 0x10c   : > { %1579 = vmatpush3.msra.mxu0 %v1873_v27  ;;  %1638 = vmatpush3.msra.mxu1 %v1873_v27 }
 0x10d   : > { %1580 = vmatprep.subr.mxu0 %v1877_v28  ;;  %1623 = vmatprep.subr.mxu1 %v1877_v28 }
 0x10e   : > { %1581 = vmatpush3.msra.mxu0 %v1877_v28  ;;  %1639 = vmatpush3.msra.mxu1 %v1877_v28 }
 0x10f   : > { %1582 = vmatprep.subr.mxu0 %v1867_v25  ;;  %1624 = vmatprep.subr.mxu1 %v1867_v25 }
 0x110   : > { %1583 = vmatpush3.msra.mxu0 %v1867_v25  ;;  %1640 = vmatpush3.msra.mxu1 %v1867_v25 }
 0x111   : > { %1584 = vmatprep.subr.mxu0 %v1869_v26  ;;  %1625 = vmatprep.subr.mxu1 %v1869_v26 }
 0x112   : > { %1585 = vmatpush3.msra.mxu0 %v1869_v26  ;;  %1641 = vmatpush3.msra.mxu1 %v1869_v26 }
 0x199   : > { %v1532_v41 = vpop.f32.mrf.mxu1 }
 0x19a   : > { %741 = vperm.xlu1 %1652, %v1532_v41   ;;  %658 = vrot.lane.b32.xlu0 %v1532_v41, %s1759_s17 }
 0x19b   : > { %v561_v42 = vpop.f32.mrf.mxu1 }
 0x19d   : > { %v1535_v43 = vpop.f32.mrf.mxu1 }
 0x19e   : > { %656 = vrot.lane.b32.xlu0 %v561_v42, %s1759_s17  ;;  %662 = vrot.lane.b32.xlu1 %v1535_v43, %s1759_s17 }
 0x19f   : > { %v571_v44 = vpop.f32.mrf.mxu1 }
 0x1a1   : > { %v1538_v45 = vpop.f32.mrf.mxu1 }
 0x1a2   : > { %737 = vperm.xlu0 %1653, %v561_v42   ;;  %749 = vperm.xlu1 %1652, %v1535_v43  }
 0x1a3   : > { %v581_v46 = vpop.f32.mrf.mxu1 }
 0x1a5   : > { %v1541_v47 = vpop.f32.mrf.mxu1 }
 0x1a6   : > { %660 = vrot.lane.b32.xlu1 %v571_v44, %s1759_s17  ;;  %664 = vrot.lane.b32.xlu0 %v581_v46, %s1759_s17 }
 0x1a7   : > { %v591_v48 = vpop.f32.mrf.mxu1 }
 0x1a9   : > { %v1544_v49 = vpop.f32.mrf.mxu1 }
 0x1aa   : > { %745 = vperm.xlu1 %1652, %v571_v44   ;;  %668 = vrot.lane.b32.xlu0 %v591_v48, %s1759_s17 }
 0x1ab   : > { %v601_v50 = vpop.f32.mrf.mxu1 }
 0x1ad   : > { %v1547_v51 = vpop.f32.mrf.mxu1 }
 0x1ae   : > { %666 = vrot.lane.b32.xlu1 %v1538_v45, %s1759_s17  ;;  %773 = vperm.xlu0 %1653, %v1544_v49  }
 0x1af   : > { %v611_v52 = vpop.f32.mrf.mxu1 }
 0x1b1   : > { %v1550_v53 = vpop.f32.mrf.mxu1 }
 0x1b2   : > { %757 = vperm.xlu1 %1652, %v1538_v45   ;;  %672 = vrot.lane.b32.xlu0 %v601_v50, %s1759_s17 }
 0x1b3   : > { %v621_v54 = vpop.f32.mrf.mxu1 }
 0x1b6   : > { %753 = vperm.xlu1 %1652, %v581_v46   ;;  %781 = vperm.xlu0 %1653, %v1547_v51   ;;  %v868_v46 = vld [vmem:[%s2305_s3] sm:$0xff] }
 0x1ba   : > { %670 = vrot.lane.b32.xlu1 %v1541_v47, %s1759_s17  ;;  %676 = vrot.lane.b32.xlu0 %v611_v52, %s1759_s17 }
 0x1be   : > { %674 = vrot.lane.b32.xlu1 %v1544_v49, %s1759_s17  ;;  %777 = vperm.xlu0 %1653, %v611_v52   ;;  %v876_v52 = vld [vmem:[%s2305_s3 + $0x40] sm:$0xff] }
 0x1c2   : > { %769 = vperm.xlu1 %1652, %v601_v50   ;;  %680 = vrot.lane.b32.xlu0 %v621_v54, %s1759_s17 }
 0x1c6   : > { %678 = vrot.lane.b32.xlu1 %v1547_v51, %s1759_s17  ;;  %785 = vperm.xlu0 %1653, %v621_v54  }
 0x1c7   : > { %v1553_v55 = vpop.f32.mrf.mxu1 }
 0x1c9   : > { %v631_v56 = vpop.f32.mrf.mxu1 }
 0x1ca   : > { %682 = vrot.lane.b32.xlu1 %v1550_v53, %s1759_s17  ;;  %684 = vrot.lane.b32.xlu0 %v631_v56, %s1759_s17 }
 0x1ce   : > { %686 = vrot.lane.b32.xlu1 %v1553_v55, %s1759_s17  ;;  %789 = vperm.xlu0 %1653, %v1550_v53  }
 0x1d2   : > { %761 = vperm.xlu1 %1652, %v591_v48   ;;  %797 = vperm.xlu0 %1653, %v1553_v55  }
 0x1d6   : > { %765 = vperm.xlu1 %1652, %v1541_v47   ;;  %793 = vperm.xlu0 %1653, %v631_v56  }
 0x20c   : > { %v659_v57 = vpop.permute.xlu0 %658 }
 0x210   : > { %v657_v58 = vpop.permute.xlu0 %656 }
 0x211   : > { %704 = vxpose.xlu1.b32.start [1/16] (narrow) %v657_v58, 8 }
 0x215   : > { %v742_v59 = vpop.permute.xlu1 %741  ;;  %705 = vxpose.xlu1.b32.cont [2/16] (narrow) %v659_v57, 8  ;;  %v869_v57 = vld [vmem:[%s2305_s3 + $0x8] sm:$0xff] }
 0x219   : > { %v663_v60 = vpop.permute.xlu1 %662 }
 0x21d   : > { %v738_v61 = vpop.permute.xlu0 %737  ;;  %v2011_v62 = vpop.permute.xlu1 %749 }
 0x221   : > { %v661_v63 = vpop.permute.xlu1 %660  ;;  %v665_v0 = vpop.permute.xlu0 %664 }
 0x222   : > { %706 = vxpose.xlu1.b32.cont [3/16] (narrow) %v661_v63, 8  ;;  %v877_v63 = vld [vmem:[%s2305_s3 + $0x48] sm:$0xff] }
 0x225   : > { %v746_v1 = vpop.permute.xlu1 %745  ;;  %v669_v2 = vpop.permute.xlu0 %668 }
 0x226   : > { %707 = vxpose.xlu1.b32.cont [4/16] (narrow) %v663_v60, 8 }
 0x229   : > { %v667_v3 = vpop.permute.xlu1 %666  ;;  %v774_v4 = vpop.permute.xlu0 %773 }
 0x22a   : > { %708 = vxpose.xlu1.b32.cont [5/16] (narrow) %v665_v0, 8 }
 0x22d   : > { %v2013_v5 = vpop.permute.xlu1 %757  ;;  %v673_v6 = vpop.permute.xlu0 %672 }
 0x22e   : > { %709 = vxpose.xlu1.b32.cont [6/16] (narrow) %v667_v3, 8 }
 0x231   : > { %v2015_v7 = vpop.permute.xlu1 %753  ;;  %v2017_v8 = vpop.permute.xlu0 %781 }
 0x232   : > { %710 = vxpose.xlu1.b32.cont [7/16] (narrow) %v669_v2, 8 }
 0x235   : > { %v671_v9 = vpop.permute.xlu1 %670  ;;  %v677_v10 = vpop.permute.xlu0 %676 }
 0x236   : > { %711 = vxpose.xlu1.b32.cont [8/16] (narrow) %v671_v9, 8 }
 0x239   : > { %v675_v11 = vpop.permute.xlu1 %674  ;;  %v778_v12 = vpop.permute.xlu0 %777 }
 0x23a   : > { %712 = vxpose.xlu1.b32.cont [9/16] (narrow) %v673_v6, 8 }
 0x23d   : > { %v770_v13 = vpop.permute.xlu1 %769  ;;  %v681_v14 = vpop.permute.xlu0 %680 }
 0x23e   : > { %713 = vxpose.xlu1.b32.cont [10/16] (narrow) %v675_v11, 8 }
 0x241   : > { %v679_v15 = vpop.permute.xlu1 %678  ;;  %v2019_v16 = vpop.permute.xlu0 %785 }
 0x242   : > { %714 = vxpose.xlu1.b32.cont [11/16] (narrow) %v677_v10, 8 }
 0x245   : > { %v683_v17 = vpop.permute.xlu1 %682  ;;  %v685_v18 = vpop.permute.xlu0 %684 }
 0x246   : > { %715 = vxpose.xlu1.b32.cont [12/16] (narrow) %v679_v15, 8 }
 0x249   : > { %v687_v19 = vpop.permute.xlu1 %686 }
 0x24a   : > { %716 = vxpose.xlu1.b32.cont [13/16] (narrow) %v681_v14, 8 }
 0x24d   : > { %v2021_v21 = vpop.permute.xlu1 %761 }
 0x24e   : > { %717 = vxpose.xlu1.b32.cont [14/16] (narrow) %v683_v17, 8  ;;  %v871_v17 = vld [vmem:[%s2305_s3 + $0x18] sm:$0xff] }
 0x251   : > { %v2023_v23 = vpop.permute.xlu1 %765 }
 0x252   : > { %718 = vxpose.xlu1.b32.cont [15/16] (narrow) %v685_v18, 8 }
 0x256   : > { %719 = vxpose.xlu1.b32.end [16/16] (narrow) %v687_v19, 8 }
 0x296   : > { %v720_v41 = vpop.trf.xlu1 }
 0x297   : > { %v2025_v42 = vrot.slane %v720_v41, %v802_v24 }
 0x299   : > { %v804_v43 = vadd.f32 %v2025_v42, %v738_v61  ;;  %v812_v44 = vadd.f32 %v2025_v42, %v770_v13  ;;  %v805_v48 = vadd.f32 %v2025_v42, %v742_v59  ;;  %v813_v54 = vadd.f32 %v2025_v42, %v774_v4 }
 0x29a   : > { %v806_v59 = vadd.f32 %v2025_v42, %v746_v1  ;;  %v814_v2 = vadd.f32 %v2025_v42, %v778_v12  ;;  %v870_v1 = vld [vmem:[%s2305_s3 + $0x10] sm:$0xff]  ;;  %v807_v9 = vadd.f32 %v2025_v42, %v2011_v62  ;;  %v815_v14 = vadd.f32 %v2025_v42, %v2017_v8 }
 0x29b   : > { %vm820_vm1 = vcmp.gt.f32.partialorder %v804_v43, 0.0  ;;  %v836_v45 = vmul.f32 0.2, %v804_v43  ;;  %v844_v47 = vmul.f32 0.2, %v812_v44  ;;  %vm828_vm2 = vcmp.gt.f32.partialorder %v812_v44, 0.0 }
 0x29c   : > { %v837_v53 = vmul.f32 0.2, %v805_v48  ;;  %vm821_vm3 = vcmp.gt.f32.partialorder %v805_v48, 0.0  ;;  %v845_v58 = vmul.f32 0.2, %v813_v54  ;;  %vm829_vm4 = vcmp.gt.f32.partialorder %v813_v54, 0.0 }
 0x29d   : > { %v852_v49 = vsel %vm820_vm1, %v804_v43, %v836_v45  ;;  %v860_v51 = vsel %vm828_vm2, %v812_v44, %v844_v47  ;;  %v838_v0 = vmul.f32 0.2, %v806_v59  ;;  %vm822_vm5 = vcmp.gt.f32.partialorder %v806_v59, 0.0  ;;  %v878_v12 = vld [vmem:[%s2305_s3 + $0x50] sm:$0xff]  ;;  %v790_v43 = vpop.permute.xlu0 %789  ;;  %v872_v45 = vld [vmem:[%s2305_s3 + $0x20] sm:$0xff] }
 0x29e   : > { %v2033_v50 = vadd.f32 %v868_v46, %v852_v49  ;;  %v2040_v55 = vadd.f32 %v876_v52, %v860_v51  ;;  %v853_v56 = vsel %vm821_vm3, %v805_v48, %v837_v53  ;;  %v861_v61 = vsel %vm829_vm4, %v813_v54, %v845_v58  ;;  %v880_v49 = vld [vmem:[%s2305_s3 + $0x60] sm:$0xff] }
 0x29f   : > { %v2047_v60 = vadd.f32 %v869_v57, %v853_v56  ;;  %v2054_v3 = vadd.f32 %v877_v63, %v861_v61  ;;  %v854_v4 = vsel %vm822_vm5, %v806_v59, %v838_v0  ;;  %v846_v6 = vmul.f32 0.2, %v814_v2  ;;  %v873_v56 = vld [vmem:[%s2305_s3 + $0x28] sm:$0xff] }
 0x2a0   : > { %900 = vmax.xlane.f32.xlu0 %v2033_v50  ;;  %vm830_vm6 = vcmp.gt.f32.partialorder %v814_v2, 0.0  ;;  %v2062_v10 = vadd.f32 %v870_v1, %v854_v4  ;;  %v839_v13 = vmul.f32 0.2, %v807_v9  ;;  %vm823_vm7 = vcmp.gt.f32.partialorder %v807_v9, 0.0  ;;  %v881_v0 = vld [vmem:[%s2305_s3 + $0x68] sm:$0xff] }
 0x2a1   : > { %v862_v11 = vsel %vm830_vm6, %v814_v2, %v846_v6  ;;  %v847_v18 = vmul.f32 0.2, %v815_v14  ;;  %v808_v19 = vadd.f32 %v2025_v42, %v2015_v7  ;;  %vm831_vm8 = vcmp.gt.f32.partialorder %v815_v14, 0.0  ;;  %v798_v53 = vpop.permute.xlu0 %797  ;;  %v874_v6 = vld [vmem:[%s2305_s3 + $0x30] sm:$0xff] }
 0x2a2   : > { %v2070_v15 = vadd.f32 %v878_v12, %v862_v11  ;;  %v855_v62 = vsel %vm823_vm7, %v807_v9, %v839_v13  ;;  %v816_v41 = vadd.f32 %v2025_v42, %v2019_v16  ;;  %v809_v47 = vadd.f32 %v2025_v42, %v2013_v5 }
 0x2a3   : > { %v2078_v20 = vadd.f32 %v871_v17, %v855_v62  ;;  %v863_v8 = vsel %vm831_vm8, %v815_v14, %v847_v18  ;;  %v840_v24 = vmul.f32 0.2, %v808_v19  ;;  %vm824_vm9 = vcmp.gt.f32.partialorder %v808_v19, 0.0  ;;  %v882_v14 = vld [vmem:[%s2305_s3 + $0x70] sm:$0xff] }
 0x2a4   : > { %916 = vmax.xlane.f32.xlu0 %v2040_v55  ;;  %v2086_v44 = vadd.f32 %v879_v22, %v863_v8  ;;  %v848_v46 = vmul.f32 0.2, %v816_v41  ;;  %vm832_vm10 = vcmp.gt.f32.partialorder %v816_v41, 0.0  ;;  %v841_v51 = vmul.f32 0.2, %v809_v47 }
 0x2a5   : > { %v856_v7 = vsel %vm824_vm9, %v808_v19, %v840_v24  ;;  %v817_v52 = vadd.f32 %v2025_v42, %v790_v43  ;;  %vm825_vm11 = vcmp.gt.f32.partialorder %v809_v47, 0.0  ;;  %v810_v58 = vadd.f32 %v2025_v42, %v2021_v21  ;;  %v794_v59 = vpop.permute.xlu0 %793 }
 0x2a6   : > { %v2094_v48 = vadd.f32 %v872_v45, %v856_v7  ;;  %v864_v16 = vsel %vm832_vm10, %v816_v41, %v848_v46  ;;  %v857_v5 = vsel %vm825_vm11, %v809_v47, %v841_v51  ;;  %v818_v4 = vadd.f32 %v2025_v42, %v794_v59 }
 0x2a7   : > { %v2101_v54 = vadd.f32 %v880_v49, %v864_v16  ;;  %v849_v57 = vmul.f32 0.2, %v817_v52  ;;  %vm833_vm12 = vcmp.gt.f32.partialorder %v817_v52, 0.0  ;;  %v2109_v61 = vadd.f32 %v873_v56, %v857_v5 }
 0x2a8   : > { %902 = vmax.xlane.f32.xlu0 %v2047_v60  ;;  %v842_v2 = vmul.f32 0.2, %v810_v58  ;;  %vm826_vm13 = vcmp.gt.f32.partialorder %v810_v58, 0.0  ;;  %v850_v9 = vmul.f32 0.2, %v818_v4  ;;  %v811_v11 = vadd.f32 %v2025_v42, %v2023_v23  ;;  %v875_v23 = vld [vmem:[%s2305_s3 + $0x38] sm:$0xff] }
 0x2a9   : > { %v865_v63 = vsel %vm833_vm12, %v817_v52, %v849_v57  ;;  %vm834_vm14 = vcmp.gt.f32.partialorder %v818_v4, 0.0  ;;  %v819_v17 = vadd.f32 %v2025_v42, %v798_v53  ;;  %v883_v42 = vld [vmem:[%s2305_s3 + $0x78] sm:$0xff] }
 0x2aa   : > { %v2116_v1 = vadd.f32 %v881_v0, %v865_v63  ;;  %v858_v21 = vsel %vm826_vm13, %v810_v58, %v842_v2  ;;  %v866_v13 = vsel %vm834_vm14, %v818_v4, %v850_v9  ;;  %v843_v62 = vmul.f32 0.2, %v811_v11 }
 0x2ab   : > { %v2124_v12 = vadd.f32 %v874_v6, %v858_v21  ;;  %vm827_vm15 = vcmp.gt.f32.partialorder %v811_v11, 0.0  ;;  %v2131_v18 = vadd.f32 %v882_v14, %v866_v13  ;;  %v851_v8 = vmul.f32 0.2, %v819_v17 }
 0x2ac   : > { %918 = vmax.xlane.f32.xlu0 %v2054_v3  ;;  %v859_v19 = vsel %vm827_vm15, %v811_v11, %v843_v62  ;;  %vm835_vm1 = vcmp.gt.f32.partialorder %v819_v17, 0.0 }
 0x2ad   : > { %v2137_v22 = vadd.f32 %v875_v23, %v859_v19  ;;  %v867_v24 = vsel %vm835_vm1, %v819_v17, %v851_v8 }
 0x2ae   : > { %v2143_v41 = vadd.f32 %v883_v42, %v867_v24 }
 0x2b0   : > { %904 = vmax.xlane.f32.xlu0 %v2062_v10 }
 0x2b4   : > { %920 = vmax.xlane.f32.xlu0 %v2070_v15 }
 0x2b8   : > { %906 = vmax.xlane.f32.xlu0 %v2078_v20 }
 0x2bc   : > { %922 = vmax.xlane.f32.xlu0 %v2086_v44 }
 0x2c0   : > { %908 = vmax.xlane.f32.xlu0 %v2094_v48 }
 0x2c4   : > { %924 = vmax.xlane.f32.xlu0 %v2101_v54 }
 0x2c8   : > { %910 = vmax.xlane.f32.xlu0 %v2109_v61 }
 0x2cc   : > { %926 = vmax.xlane.f32.xlu0 %v2116_v1 }
 0x2d0   : > { %912 = vmax.xlane.f32.xlu0 %v2124_v12 }
 0x2d4   : > { %928 = vmax.xlane.f32.xlu0 %v2131_v18 }
 0x2d8   : > { %914 = vmax.xlane.f32.xlu0 %v2137_v22 }
 0x2dc   : > { %930 = vmax.xlane.f32.xlu0 %v2143_v41 }
 0x329   : > { %v901_v43 = vpop.xlane.xlu0 %900 }
 0x32a   : > { %v932_v7 = vsub.f32 %v2033_v50, %v901_v43 }
 0x32c   : > { %v948_v45 = vmul.f32 1.442695, %v932_v7 }
 0x32d   : > { %v917_v46 = vpop.xlane.xlu0 %916 }
 0x32e   : > { %1654 = vpow2.f32 %v948_v45  ;;  %v940_v47 = vsub.f32 %v2040_v55, %v917_v46 }
 0x330   : > { %v964_v16 = vmul.f32 1.442695, %v940_v47 }
 0x331   : > { %v903_v49 = vpop.xlane.xlu0 %902 }
 0x332   : > { %1656 = vpow2.f32 %v964_v16  ;;  %v933_v51 = vsub.f32 %v2047_v60, %v903_v49 }
 0x334   : > { %v950_v52 = vmul.f32 1.442695, %v933_v51 }
 0x335   : > { %v919_v53 = vpop.xlane.xlu0 %918 }
 0x336   : > { %1658 = vpow2.f32 %v950_v52  ;;  %v941_v5 = vsub.f32 %v2054_v3, %v919_v53 }
 0x338   : > { %v966_v56 = vmul.f32 1.442695, %v941_v5 }
 0x339   : > { %v905_v57 = vpop.xlane.xlu0 %904 }
 0x33a   : > { %1660 = vpow2.f32 %v966_v56  ;;  %v934_v50 = vsub.f32 %v2062_v10, %v905_v57 }
 0x33b   : > { %v2151_v58 = vpop.eup %1654 }
 0x33c   : > { %v952_v59 = vmul.f32 1.442695, %v934_v50  ;;  %980 = vadd.xlane.f32.xlu0 %v2151_v58 }
 0x33d   : > { %v921_v55 = vpop.xlane.xlu0 %920 }
 0x33e   : > { %1662 = vpow2.f32 %v952_v59  ;;  %v942_v63 = vsub.f32 %v2070_v15, %v921_v55 }
 0x33f   : > { %v2155_v60 = vpop.eup %1656 }
 0x340   : > { %v968_v0 = vmul.f32 1.442695, %v942_v63  ;;  %996 = vadd.xlane.f32.xlu0 %v2155_v60 }
 0x341   : > { %v907_v3 = vpop.xlane.xlu0 %906 }
 0x342   : > { %1664 = vpow2.f32 %v968_v0  ;;  %v935_v2 = vsub.f32 %v2078_v20, %v907_v3 }
 0x343   : > { %v2159_v4 = vpop.eup %1658 }
 0x344   : > { %v954_v10 = vmul.f32 1.442695, %v935_v2  ;;  %982 = vadd.xlane.f32.xlu1 %v2159_v4 }
 0x345   : > { %v923_v21 = vpop.xlane.xlu0 %922 }
 0x346   : > { %1666 = vpow2.f32 %v954_v10  ;;  %v943_v6 = vsub.f32 %v2086_v44, %v923_v21 }
 0x347   : > { %v2163_v9 = vpop.eup %1660 }
 0x348   : > { %v970_v15 = vmul.f32 1.442695, %v943_v6  ;;  %998 = vadd.xlane.f32.xlu0 %v2163_v9 }
 0x349   : > { %v909_v11 = vpop.xlane.xlu0 %908 }
 0x34a   : > { %1668 = vpow2.f32 %v970_v15  ;;  %v936_v13 = vsub.f32 %v2094_v48, %v909_v11 }
 0x34b   : > { %v2167_v14 = vpop.eup %1662 }
 0x34c   : > { %v956_v20 = vmul.f32 1.442695, %v936_v13  ;;  %984 = vadd.xlane.f32.xlu0 %v2167_v14 }
 0x34d   : > { %v925_v62 = vpop.xlane.xlu0 %924 }
 0x34e   : > { %1670 = vpow2.f32 %v956_v20  ;;  %v944_v17 = vsub.f32 %v2101_v54, %v925_v62 }
 0x34f   : > { %v2171_v19 = vpop.eup %1664 }
 0x350   : > { %v972_v44 = vmul.f32 1.442695, %v944_v17  ;;  %1000 = vadd.xlane.f32.xlu0 %v2171_v19 }
 0x351   : > { %v911_v23 = vpop.xlane.xlu0 %910 }
 0x352   : > { %1672 = vpow2.f32 %v972_v44  ;;  %v937_v8 = vsub.f32 %v2109_v61, %v911_v23 }
 0x353   : > { %v2175_v24 = vpop.eup %1666 }
 0x354   : > { %v958_v48 = vmul.f32 1.442695, %v937_v8  ;;  %986 = vadd.xlane.f32.xlu0 %v2175_v24 }
 0x355   : > { %v927_v42 = vpop.xlane.xlu0 %926 }
 0x356   : > { %1674 = vpow2.f32 %v958_v48  ;;  %v945_v43 = vsub.f32 %v2116_v1, %v927_v42 }
 0x357   : > { %v2179_v7 = vpop.eup %1668 }
 0x358   : > { %v974_v54 = vmul.f32 1.442695, %v945_v43  ;;  %1002 = vadd.xlane.f32.xlu0 %v2179_v7 }
 0x359   : > { %v913_v45 = vpop.xlane.xlu0 %912 }
 0x35a   : > { %1676 = vpow2.f32 %v974_v54  ;;  %v938_v46 = vsub.f32 %v2124_v12, %v913_v45 }
 0x35b   : > { %v2183_v47 = vpop.eup %1670 }
 0x35c   : > { %v960_v61 = vmul.f32 1.442695, %v938_v46  ;;  %988 = vadd.xlane.f32.xlu0 %v2183_v47 }
 0x35d   : > { %v929_v16 = vpop.xlane.xlu0 %928 }
 0x35e   : > { %1678 = vpow2.f32 %v960_v61  ;;  %v946_v49 = vsub.f32 %v2131_v18, %v929_v16 }
 0x35f   : > { %v2187_v51 = vpop.eup %1672 }
 0x360   : > { %v976_v1 = vmul.f32 1.442695, %v946_v49  ;;  %1004 = vadd.xlane.f32.xlu0 %v2187_v51 }
 0x361   : > { %v915_v52 = vpop.xlane.xlu0 %914 }
 0x362   : > { %1680 = vpow2.f32 %v976_v1  ;;  %v939_v53 = vsub.f32 %v2137_v22, %v915_v52 }
 0x363   : > { %v2191_v5 = vpop.eup %1674 }
 0x364   : > { %v962_v12 = vmul.f32 1.442695, %v939_v53  ;;  %990 = vadd.xlane.f32.xlu0 %v2191_v5 }
 0x365   : > { %v931_v56 = vpop.xlane.xlu0 %930 }
 0x366   : > { %1682 = vpow2.f32 %v962_v12  ;;  %v947_v57 = vsub.f32 %v2143_v41, %v931_v56 }
 0x367   : > { %v2195_v50 = vpop.eup %1676 }
 0x368   : > { %v978_v18 = vmul.f32 1.442695, %v947_v57  ;;  %1006 = vadd.xlane.f32.xlu0 %v2195_v50 }
 0x36a   : > { %1684 = vpow2.f32 %v978_v18 }
 0x36b   : > { %v2198_v59 = vpop.eup %1678 }
 0x36c   : > { %992 = vadd.xlane.f32.xlu0 %v2198_v59 }
 0x36f   : > { %v2201_v22 = vpop.eup %1680 }
 0x370   : > { %1008 = vadd.xlane.f32.xlu1 %v2201_v22 }
 0x373   : > { %v2204_v55 = vpop.eup %1682 }
 0x374   : > { %994 = vadd.xlane.f32.xlu0 %v2204_v55 }
 0x377   : > { %v2207_v63 = vpop.eup %1684 }
 0x378   : > { %1010 = vadd.xlane.f32.xlu1 %v2207_v63 }
 0x3c5   : > { %v981_v41 = vpop.xlane.xlu0 %980 }
 0x3c6   : > { %1686 = vrcp.f32 %v981_v41 }
 0x3c9   : > { %v997_v0 = vpop.xlane.xlu0 %996 }
 0x3ca   : > { %1688 = vrcp.f32 %v997_v0 }
 0x3cd   : > { %v983_v3 = vpop.xlane.xlu1 %982 }
 0x3ce   : > { %1690 = vrcp.f32 %v983_v3 }
 0x3d1   : > { %v999_v2 = vpop.xlane.xlu0 %998 }
 0x3d2   : > { %1692 = vrcp.f32 %v999_v2 }
 0x3d3   : > { %v1687_v10 = vpop.eup %1686 }
 0x3d4   : > { %v1028_v21 = vmul.f32 %v1687_v10, %v2151_v58 }
 0x3d5   : > { %v985_v6 = vpop.xlane.xlu0 %984 }
 0x3d6   : > { %1694 = vrcp.f32 %v985_v6  ;;  %1586 = vmatprep.mubr.f32.mxu0 %v1028_v21 }
 0x3d7   : > { %v1689_v15 = vpop.eup %1688 }
 0x3d8   : > { %v1036_v11 = vmul.f32 %v1689_v15, %v2155_v60 }
 0x3d9   : > { %v1001_v13 = vpop.xlane.xlu0 %1000 }
 0x3da   : > { %1696 = vrcp.f32 %v1001_v13  ;;  %1598 = vmatprep.mubr.f32.mxu1 %v1036_v11 }
 0x3db   : > { %v1691_v20 = vpop.eup %1690 }
 0x3dc   : > { %v1029_v62 = vmul.f32 %v1691_v20, %v2159_v4 }
 0x3dd   : > { %v987_v17 = vpop.xlane.xlu0 %986 }
 0x3de   : > { %1698 = vrcp.f32 %v987_v17  ;;  %1587 = vmatmul.mubr.f32.vlgmr.msra.gmra.mxu0 %v1029_v62 }
 0x3df   : > { %v1693_v44 = vpop.eup %1692 }
 0x3e0   : > { %v1037_v23 = vmul.f32 %v1693_v44, %v2163_v9 }
 0x3e1   : > { %v1003_v8 = vpop.xlane.xlu0 %1002 }
 0x3e2   : > { %1700 = vrcp.f32 %v1003_v8  ;;  %1599 = vmatmul.mubr.f32.vlgmr.msra.gmra.mxu1 %v1037_v23 }
 0x3e3   : > { %v1695_v58 = vpop.eup %1694 }
 0x3e4   : > { %v1030_v48 = vmul.f32 %v1695_v58, %v2167_v14 }
 0x3e5   : > { %v989_v42 = vpop.xlane.xlu0 %988 }
 0x3e6   : > { %1702 = vrcp.f32 %v989_v42  ;;  %1589 = vmatprep.mubr.f32.mxu0 %v1030_v48 }
 0x3e7   : > { %v1697_v60 = vpop.eup %1696 }
 0x3e8   : > { %v1038_v43 = vmul.f32 %v1697_v60, %v2171_v19 }
 0x3e9   : > { %v1005_v54 = vpop.xlane.xlu0 %1004 }
 0x3ea   : > { %1704 = vrcp.f32 %v1005_v54  ;;  %1601 = vmatprep.mubr.f32.mxu1 %v1038_v43 }
 0x3eb   : > { %v1699_v4 = vpop.eup %1698 }
 0x3ec   : > { %v1031_v45 = vmul.f32 %v1699_v4, %v2175_v24 }
 0x3ed   : > { %v991_v46 = vpop.xlane.xlu0 %990 }
 0x3ee   : > { %1706 = vrcp.f32 %v991_v46  ;;  %1590 = vmatmul.mubr.f32.gmra.mxu0 %v1031_v45 }
 0x3ef   : > { %v1701_v9 = vpop.eup %1700 }
 0x3f0   : > { %v1039_v61 = vmul.f32 %v1701_v9, %v2179_v7 }
 0x3f1   : > { %v1007_v16 = vpop.xlane.xlu0 %1006 }
 0x3f2   : > { %1708 = vrcp.f32 %v1007_v16  ;;  %1602 = vmatmul.mubr.f32.gmra.mxu1 %v1039_v61 }
 0x3f3   : > { %v1703_v14 = vpop.eup %1702 }
 0x3f4   : > { %v1032_v49 = vmul.f32 %v1703_v14, %v2183_v47 }
 0x3f5   : > { %v993_v1 = vpop.xlane.xlu0 %992 }
 0x3f6   : > { %1710 = vrcp.f32 %v993_v1  ;;  %1592 = vmatprep.mubr.f32.mxu0 %v1032_v49 }
 0x3f7   : > { %v1705_v19 = vpop.eup %1704 }
 0x3f8   : > { %v1040_v52 = vmul.f32 %v1705_v19, %v2187_v51 }
 0x3f9   : > { %v1009_v53 = vpop.xlane.xlu1 %1008 }
 0x3fa   : > { %1712 = vrcp.f32 %v1009_v53  ;;  %1604 = vmatprep.mubr.f32.mxu1 %v1040_v52 }
 0x3fb   : > { %v1707_v24 = vpop.eup %1706 }
 0x3fc   : > { %v1033_v12 = vmul.f32 %v1707_v24, %v2191_v5 }
 0x3fd   : > { %v995_v56 = vpop.xlane.xlu0 %994 }
 0x3fe   : > { %1714 = vrcp.f32 %v995_v56  ;;  %1593 = vmatmul.mubr.f32.gmra.mxu0 %v1033_v12 }
 0x3ff   : > { %v1709_v7 = vpop.eup %1708 }
 0x400   : > { %v1041_v57 = vmul.f32 %v1709_v7, %v2195_v50  ;;  %v2226_v50 = vstv %s1044_s28 }
 0x401   : > { %v1011_v18 = vpop.xlane.xlu1 %1010  ;;  %v1047_v21 = vmul.f32 %v1867_v25, %v2226_v50  ;;  %v1054_v17 = vmul.f32 %v2226_v50, %v1901_v34  ;;  %v1049_v8 = vmul.f32 %v1873_v27, %v2226_v50  ;;  %v1048_v48 = vmul.f32 %v2226_v50, %v1877_v28 }
 0x402   : > { %1716 = vrcp.f32 %v1011_v18  ;;  %1605 = vmatmul.mubr.f32.gmra.mxu1 %v1041_v57  ;;  %v1057_v27 = vmul.f32 %v1905_v35, %v2226_v50  ;;  %v1056_v9 = vmul.f32 %v2226_v50, %v1909_v36  ;;  %v1051_v7 = vmul.f32 %v1881_v29, %v2226_v50 }
 0x403   : > { %v1711_v47 = vpop.eup %1710 }
 0x404   : > { %v1034_v41 = vmul.f32 %v1711_v47, %v2198_v59  ;;  %v1050_v47 = vmul.f32 %v2226_v50, %v1885_v30 }
 0x406   : > { %1595 = vmatprep.mubr.f32.mxu0 %v1034_v41 }
 0x407   : > { %v1713_v51 = vpop.eup %1712 }
 0x408   : > { %v1042_v0 = vmul.f32 %v1713_v51, %v2201_v22  ;;  %v1046_v22 = vmul.f32 %v2226_v50, %v1869_v26 }
 0x40a   : > { %1607 = vmatprep.mubr.f32.mxu1 %v1042_v0 }
 0x40b   : > { %v1715_v3 = vpop.eup %1714 }
 0x40c   : > { %v1035_v5 = vmul.f32 %v1715_v3, %v2204_v55  ;;  %v1055_v55 = vmul.f32 %v1897_v33, %v2226_v50 }
 0x40e   : > { %1596 = vmatmul.mubr.f32.gmra.mxu0 %v1035_v5 }
 0x40f   : > { %v1717_v2 = vpop.eup %1716 }
 0x410   : > { %v1043_v10 = vmul.f32 %v1717_v2, %v2207_v63  ;;  %v1059_v2 = vmul.f32 %v1913_v37, %v2226_v50 }
 0x412   : > { %1608 = vmatmul.mubr.f32.gmra.mxu1 %v1043_v10 }
 0x49e   : > { %v1588_v59 = vpop.f32.mrf.mxu0 }
 0x49f   : > { %v1134_v6 = vadd.f32 %v1588_v59, %v1047_v21 }
 0x4a0   : > { %v1128_v15 = vpop.f32.mrf.mxu0 }
 0x4a1   : > { %v1225_v11 = vmul.f32 1.442695, %v1134_v6  ;;  %v1129_v13 = vadd.f32 %v1128_v15, %v1046_v22  ;;  %vm1208_vm2 = vcmp.gt.f32.partialorder %v1134_v6, 0.0 }
 0x4a2   : > { %v1600_v20 = vpop.f32.mrf.mxu1 }
 0x4a3   : > { %1718 = vpow2.f32 %v1225_v11  ;;  %v1223_v63 = vmul.f32 1.442695, %v1129_v13  ;;  %v1174_v62 = vadd.f32 %v1600_v20, %v1055_v55  ;;  %vm1207_vm3 = vcmp.gt.f32.partialorder %v1129_v13, 0.0 }
 0x4a4   : > { %v1168_v25 = vpop.f32.mrf.mxu1 }
 0x4a5   : > { %1720 = vpow2.f32 %v1223_v63  ;;  %v1241_v44 = vmul.f32 1.442695, %v1174_v62  ;;  %v1169_v23 = vadd.f32 %v1168_v25, %v1054_v17  ;;  %vm1216_vm4 = vcmp.gt.f32.partialorder %v1174_v62, 0.0 }
 0x4a7   : > { %1722 = vpow2.f32 %v1241_v44  ;;  %v1239_v26 = vmul.f32 1.442695, %v1169_v23  ;;  %vm1215_vm5 = vcmp.gt.f32.partialorder %v1169_v23, 0.0  ;;  %v1053_v44 = vmul.f32 %v1889_v31, %v2226_v50 }
 0x4a9   : > { %1724 = vpow2.f32 %v1239_v26 }
 0x4ae   : > { %v1591_v58 = vpop.f32.mrf.mxu0 }
 0x4af   : > { %v1144_v33 = vadd.f32 %v1591_v58, %v1049_v8  ;;  %v1052_v8 = vmul.f32 %v2226_v50, %v1893_v32 }
 0x4b0   : > { %v1719_v42 = vpop.eup %1718  ;;  %v1138_v60 = vpop.f32.mrf.mxu0 }
 0x4b1   : > { %v1401_v34 = vadd.f32 -1.0, %v1719_v42  ;;  %v1229_v43 = vmul.f32 1.442695, %v1144_v33  ;;  %v1139_v54 = vadd.f32 %v1138_v60, %v1048_v48  ;;  %vm1210_vm6 = vcmp.gt.f32.partialorder %v1144_v33, 0.0 }
 0x4b2   : > { %v1721_v4 = vpop.eup %1720  ;;  %v1603_v45 = vpop.f32.mrf.mxu1 }
 0x4b3   : > { %v1272_v28 = vsel %vm1208_vm2, %v1134_v6, %v1401_v34  ;;  %v1400_v46 = vadd.f32 -1.0, %v1721_v4  ;;  %1726 = vpow2.f32 %v1229_v43  ;;  %v1227_v16 = vmul.f32 1.442695, %v1139_v54 }
 0x4b4   : > { %v1723_v61 = vpop.eup %1722  ;;  %1288 = vst.msk [vmem:[%s2245_s6 + $0x8] sm:$0xff] %vm249_vm0, %v1272_v28  ;;  %v1184_v14 = vadd.f32 %v1603_v45, %v1057_v27  ;;  %v1178_v49 = vpop.f32.mrf.mxu1  ;;  %v1058_v6 = vmul.f32 %v2226_v50, %v1917_v38  ;;  %vm1209_vm7 = vcmp.gt.f32.partialorder %v1139_v54, 0.0  ;;  %v1061_v43 = vmul.f32 %v1921_v39, %v2226_v50 }
 0x4b5   : > { %v1271_v1 = vsel %vm1207_vm3, %v1129_v13, %v1400_v46  ;;  %v1409_v19 = vadd.f32 -1.0, %v1723_v61  ;;  %v1179_v35 = vadd.f32 %v1178_v49, %v1056_v9  ;;  %1728 = vpow2.f32 %v1227_v16 }
 0x4b6   : > { %v1725_v52 = vpop.eup %1724  ;;  %1287 = vst.msk [vmem:[%s2245_s6] sm:$0xff] %vm249_vm0, %v1271_v1  ;;  %v1245_v53 = vmul.f32 1.442695, %v1184_v14  ;;  %vm1218_vm8 = vcmp.gt.f32.partialorder %v1184_v14, 0.0  ;;  %v1060_v27 = vmul.f32 %v2226_v50, %v1927_v40 }
 0x4b7   : > { %v1280_v24 = vsel %vm1216_vm4, %v1174_v62, %v1409_v19  ;;  %v1408_v36 = vadd.f32 -1.0, %v1725_v52  ;;  %v1243_v12 = vmul.f32 1.442695, %v1179_v35  ;;  %vm1217_vm9 = vcmp.gt.f32.partialorder %v1179_v35, 0.0 }
 0x4b8   : > { %1296 = vst.msk [vmem:[%s2245_s6 + $0x48] sm:$0xff] %vm249_vm0, %v1280_v24  ;;  %1730 = vpow2.f32 %v1245_v53 }
 0x4b9   : > { %v1279_v56 = vsel %vm1215_vm5, %v1169_v23, %v1408_v36  ;;  %1732 = vpow2.f32 %v1243_v12 }
 0x4ba   : > { %1295 = vst.msk [vmem:[%s2245_s6 + $0x40] sm:$0xff] %vm249_vm0, %v1279_v56 }
 0x4be   : > { %v1594_v57 = vpop.f32.mrf.mxu0 }
 0x4bf   : > { %v1154_v18 = vadd.f32 %v1594_v57, %v1051_v7 }
 0x4c0   : > { %v1727_v41 = vpop.eup %1726  ;;  %v1148_v51 = vpop.f32.mrf.mxu0 }
 0x4c1   : > { %v1403_v0 = vadd.f32 -1.0, %v1727_v41  ;;  %v1233_v3 = vmul.f32 1.442695, %v1154_v18  ;;  %v1149_v5 = vadd.f32 %v1148_v51, %v1050_v47  ;;  %vm1212_vm10 = vcmp.gt.f32.partialorder %v1154_v18, 0.0 }
 0x4c2   : > { %v1606_v10 = vpop.f32.mrf.mxu1  ;;  %v1729_v21 = vpop.eup %1728 }
 0x4c3   : > { %v1274_v59 = vsel %vm1210_vm6, %v1144_v33, %v1403_v0  ;;  %1734 = vpow2.f32 %v1233_v3  ;;  %v1231_v29 = vmul.f32 1.442695, %v1149_v5  ;;  %v1402_v30 = vadd.f32 -1.0, %v1729_v21 }
 0x4c4   : > { %1290 = vst.msk [vmem:[%s2245_s6 + $0x18] sm:$0xff] %vm249_vm0, %v1274_v59  ;;  %v1194_v22 = vadd.f32 %v1606_v10, %v1059_v2  ;;  %v1188_v15 = vpop.f32.mrf.mxu1  ;;  %vm1211_vm11 = vcmp.gt.f32.partialorder %v1149_v5, 0.0 }
 0x4c5   : > { %v1731_v11 = vpop.eup %1730  ;;  %1736 = vpow2.f32 %v1231_v29  ;;  %v1189_v37 = vadd.f32 %v1188_v15, %v1058_v6  ;;  %v1273_v55 = vsel %vm1209_vm7, %v1139_v54, %v1402_v30 }
 0x4c6   : > { %v1733_v13 = vpop.eup %1732  ;;  %v1411_v20 = vadd.f32 -1.0, %v1731_v11  ;;  %v1249_v63 = vmul.f32 1.442695, %v1194_v22  ;;  %1289 = vst.msk [vmem:[%s2245_s6 + $0x10] sm:$0xff] %vm249_vm0, %v1273_v55  ;;  %vm1220_vm12 = vcmp.gt.f32.partialorder %v1194_v22, 0.0 }
 0x4c7   : > { %v1410_v62 = vadd.f32 -1.0, %v1733_v13  ;;  %v1247_v38 = vmul.f32 1.442695, %v1189_v37  ;;  %vm1219_vm13 = vcmp.gt.f32.partialorder %v1189_v37, 0.0 }
 0x4c8   : > { %v1282_v17 = vsel %vm1218_vm8, %v1184_v14, %v1411_v20  ;;  %1738 = vpow2.f32 %v1249_v63 }
 0x4c9   : > { %1298 = vst.msk [vmem:[%s2245_s6 + $0x58] sm:$0xff] %vm249_vm0, %v1282_v17  ;;  %v1281_v25 = vsel %vm1217_vm9, %v1179_v35, %v1410_v62  ;;  %1740 = vpow2.f32 %v1247_v38 }
 0x4ca   : > { %1297 = vst.msk [vmem:[%s2245_s6 + $0x50] sm:$0xff] %vm249_vm0, %v1281_v25 }
 0x4ce   : > { %v1597_v23 = vpop.f32.mrf.mxu0 }
 0x4cf   : > { %v1164_v26 = vadd.f32 %v1597_v23, %v1053_v44 }
 0x4d0   : > { %v1735_v58 = vpop.eup %1734  ;;  %v1158_v33 = vpop.f32.mrf.mxu0 }
 0x4d1   : > { %v1405_v48 = vadd.f32 -1.0, %v1735_v58  ;;  %v1237_v42 = vmul.f32 1.442695, %v1164_v26  ;;  %v1159_v60 = vadd.f32 %v1158_v33, %v1052_v8  ;;  %vm1214_vm14 = vcmp.gt.f32.partialorder %v1164_v26, 0.0 }
 0x4d2   : > { %v1737_v34 = vpop.eup %1736  ;;  %v1609_v54 = vpop.f32.mrf.mxu1 }
 0x4d3   : > { %v1276_v4 = vsel %vm1212_vm10, %v1154_v18, %v1405_v48  ;;  %v1404_v31 = vadd.f32 -1.0, %v1737_v34  ;;  %1742 = vpow2.f32 %v1237_v42  ;;  %v1235_v32 = vmul.f32 1.442695, %v1159_v60 }
 0x4d4   : > { %1292 = vst.msk [vmem:[%s2245_s6 + $0x28] sm:$0xff] %vm249_vm0, %v1276_v4  ;;  %v1204_v45 = vadd.f32 %v1609_v54, %v1061_v43  ;;  %v1198_v28 = vpop.f32.mrf.mxu1  ;;  %vm1213_vm15 = vcmp.gt.f32.partialorder %v1159_v60, 0.0 }
 0x4d5   : > { %v1739_v46 = vpop.eup %1738  ;;  %v1275_v9 = vsel %vm1211_vm11, %v1149_v5, %v1404_v31  ;;  %v1199_v61 = vadd.f32 %v1198_v28, %v1060_v27  ;;  %1744 = vpow2.f32 %v1235_v32 }
 0x4d6   : > { %v1741_v16 = vpop.eup %1740  ;;  %1291 = vst.msk [vmem:[%s2245_s6 + $0x20] sm:$0xff] %vm249_vm0, %v1275_v9  ;;  %v1413_v39 = vadd.f32 -1.0, %v1739_v46  ;;  %v1253_v14 = vmul.f32 1.442695, %v1204_v45  ;;  %vm1222_vm1 = vcmp.gt.f32.partialorder %v1204_v45, 0.0 }
 0x4d7   : > { %v1412_v40 = vadd.f32 -1.0, %v1741_v16  ;;  %v1251_v50 = vmul.f32 1.442695, %v1199_v61  ;;  %vm1221_vm2 = vcmp.gt.f32.partialorder %v1199_v61, 0.0 }
 0x4d8   : > { %v1284_v49 = vsel %vm1220_vm12, %v1194_v22, %v1413_v39  ;;  %1746 = vpow2.f32 %v1253_v14 }
 0x4d9   : > { %1300 = vst.msk [vmem:[%s2245_s6 + $0x68] sm:$0xff] %vm249_vm0, %v1284_v49  ;;  %v1283_v1 = vsel %vm1219_vm13, %v1189_v37, %v1412_v40  ;;  %1748 = vpow2.f32 %v1251_v50 }
 0x4da   : > { %1299 = vst.msk [vmem:[%s2245_s6 + $0x60] sm:$0xff] %vm249_vm0, %v1283_v1 }
 0x4e0   : > { %v1743_v19 = vpop.eup %1742 }
 0x4e1   : > { %v1407_v35 = vadd.f32 -1.0, %v1743_v19 }
 0x4e2   : > { %v1745_v52 = vpop.eup %1744 }
 0x4e3   : > { %v1278_v53 = vsel %vm1214_vm14, %v1164_v26, %v1407_v35  ;;  %v1406_v24 = vadd.f32 -1.0, %v1745_v52 }
 0x4e4   : > { %1294 = vst.msk [vmem:[%s2245_s6 + $0x38] sm:$0xff] %vm249_vm0, %v1278_v53 }
 0x4e5   : > { %v1747_v36 = vpop.eup %1746  ;;  %v1277_v56 = vsel %vm1213_vm15, %v1159_v60, %v1406_v24 }
 0x4e6   : > { %v1749_v12 = vpop.eup %1748  ;;  %v1415_v7 = vadd.f32 -1.0, %v1747_v36  ;;  %1293 = vst.msk [vmem:[%s2245_s6 + $0x30] sm:$0xff] %vm249_vm0, %v1277_v56 }
 0x4e7   : > { %v1414_v57 = vadd.f32 -1.0, %v1749_v12 }
 0x4e8   : > { %v1286_v18 = vsel %vm1222_vm1, %v1204_v45, %v1415_v7 }
 0x4e9   : > { %1302 = vst.msk [vmem:[%s2245_s6 + $0x78] sm:$0xff] %vm249_vm0, %v1286_v18  ;;  %v1285_v47 = vsel %vm1221_vm2, %v1199_v61, %v1414_v57 }
 0x4ea   : > { %1301 = vst.msk [vmem:[%s2245_s6 + $0x70] sm:$0xff] %vm249_vm0, %v1285_v47 }
 0x4eb PF: > { %s16_s20 = sadd.s32 1, %s1756_s20  }
 0x4ec   : > { %p13_p4 = scmp.ge.s32.totalorder %s16_s20, 4  }
 0x4ee   :  { %15 = sbr.rel (!%p13_p4) target bundleno = 2 (0x2), region = 70 }

</bundles_post_ra>
